<compile_context>
chip_gen: v5e
topology: v5e:2x2
jax: 0.10.0
libtpu: 0.0.40
codegen_flags: <defaults>
</compile_context>

<pallas_src>
import jax
import jax.numpy as jnp
from jax.experimental import pallas as pl
from jax.experimental.pallas import tpu as pltpu


def attention_kernel(hid_ref, enc_ref, w1_ref, w2_ref, b_ref, v_ref, out_ref):
    # hid_ref : (TB, H)     hidden states for this batch block
    # enc_ref : (TB, S, H)  encoder outputs for this batch block
    # w1_ref  : (H, H)      hidden-half of attn weight (in->out), VMEM-resident
    # w2_ref  : (H, H)      encoder-half of attn weight (in->out), VMEM-resident
    # b_ref   : (1, H)      attn bias, VMEM-resident
    # v_ref   : (1, H)      scoring vector, VMEM-resident
    # out_ref : (TB, S)     softmax attention weights over the sequence axis
    tb, s, h = enc_ref.shape
    f32 = jnp.float32

    # Hidden half of the split Linear: (TB, H) @ (H, H) + b   (MXU).
    hid_proj = (jnp.dot(hid_ref[...].astype(f32), w1_ref[...].astype(f32),
                        preferred_element_type=f32)
                + b_ref[...].astype(f32))                         # (TB, H)

    # Encoder half as ONE (TB*S, H) @ (H, H) MXU matmul (fills the M dim).
    enc2d = enc_ref[...].astype(f32).reshape(tb * s, h)
    proj = jnp.dot(enc2d, w2_ref[...].astype(f32),
                   preferred_element_type=f32).reshape(tb, s, h)

    # Add the per-batch hidden projection, squash.
    energy = jnp.tanh(proj + hid_proj[:, None, :])                # (TB, S, H)

    # Score against v: VPU multiply + lane reduction (avoids an N=1 MXU matmul
    # and a trailing (S,1)->(1,S) transpose).
    scores = jnp.sum(energy * v_ref[...].astype(f32), axis=-1)    # (TB, S)

    # Numerically-stable softmax over the sequence axis; the divide runs on
    # the EUP via the approximate reciprocal (separate slot from VPU work).
    m = jnp.max(scores, axis=-1, keepdims=True)
    e = jnp.exp(scores - m)
    denom = jnp.sum(e, axis=-1, keepdims=True)
    out_ref[...] = (e * pl.reciprocal(denom, approx=True)).astype(out_ref.dtype)


def attention_forward(hidden, encoder_outputs, w_attn, b_attn, w_v, *, tb=None):
    """hidden: [B, H], encoder_outputs: [B, S, H]
       w_attn: [H, 2H] (PyTorch nn.Linear weight), b_attn: [H], w_v: [1, H]"""
    B, S, H = encoder_outputs.shape
    assert hidden.shape == (B, H)
    assert w_attn.shape == (H, 2 * H) and b_attn.shape == (H,) and w_v.shape == (1, H)
    out_dtype = hidden.dtype

    # Split & transpose the concat-Linear weight for in->out matmuls:
    #   cat @ W^T == hidden @ W1 + enc @ W2
    w1 = jnp.transpose(w_attn[:, :H])          # (H, H), multiplies `hidden`
    w2 = jnp.transpose(w_attn[:, H:])          # (H, H), multiplies encoder outputs
    b_row = b_attn.reshape(1, H)
    v_row = w_v.reshape(1, H)

    # Batch-block size: multiples of 8 keep every block sublane-aligned; take
    # the largest that (a) does not overshoot the (8-aligned) batch and
    # (b) fits a conservative per-buffer VMEM budget (Pallas double-buffers
    # the encoder block).
    if tb is None:
        itemsize = jnp.dtype(encoder_outputs.dtype).itemsize
        blk_bytes = S * H * itemsize
        budget = 6 * 1024 * 1024
        b_aligned = max(8, ((B + 7) // 8) * 8)
        tb = 8
        for cand in (16, 32, 64):
            if cand <= b_aligned and cand * blk_bytes <= budget:
                tb = cand
        # TODO(synk): tile over the sequence axis when even an (8, S, H)
        # encoder block exceeds the VMEM budget (very long sequences).

    # Pad the batch to a multiple of tb; padded rows are sliced off below.
    Bp = ((B + tb - 1) // tb) * tb
    if Bp != B:
        hidden = jnp.pad(hidden, ((0, Bp - B), (0, 0)))
        encoder_outputs = jnp.pad(encoder_outputs, ((0, Bp - B), (0, 0), (0, 0)))

    grid = (Bp // tb,)

    out = pl.pallas_call(
        attention_kernel,
        out_shape=jax.ShapeDtypeStruct((Bp, S), out_dtype),
        grid_spec=pltpu.PrefetchScalarGridSpec(
            num_scalar_prefetch=0,
            grid=grid,
            in_specs=[
                pl.BlockSpec((tb, H), lambda i: (i, 0)),          # hidden
                pl.BlockSpec((tb, S, H), lambda i: (i, 0, 0)),    # encoder_outputs
                # Grid-invariant weights: whole arrays resident in VMEM
                # (single copy, no per-step double-buffering).
                pl.BlockSpec(memory_space=pltpu.MemorySpace.VMEM),  # w1
                pl.BlockSpec(memory_space=pltpu.MemorySpace.VMEM),  # w2
                pl.BlockSpec(memory_space=pltpu.MemorySpace.VMEM),  # bias
                pl.BlockSpec(memory_space=pltpu.MemorySpace.VMEM),  # v
            ],
            out_specs=pl.BlockSpec((tb, S), lambda i: (i, 0)),
        ),
        compiler_params=pltpu.CompilerParams(
            dimension_semantics=("parallel",)),   # batch blocks are independent
    )(hidden, encoder_outputs, w1, w2, b_row, v_row)

    return out[:B] if Bp != B else out


def attention_reference(hidden, encoder_outputs, w_attn, b_attn, w_v):
    """Pure-JAX reference matching the PyTorch forward exactly."""
    B, S, H = encoder_outputs.shape
    hid_rep = jnp.repeat(hidden[:, None, :], S, axis=1)              # (B, S, H)
    cat = jnp.concatenate([hid_rep, encoder_outputs], axis=2)        # (B, S, 2H)
    energy = jnp.tanh(jnp.einsum("bsk,hk->bsh", cat, w_attn) + b_attn)
    attn = jnp.einsum("bsh,oh->bso", energy, w_v)[..., 0]            # (B, S)
    return jax.nn.softmax(attn, axis=1)


if __name__ == "__main__":
    B, S, H = 2, 8, 32
    key = jax.random.PRNGKey(0)
    k1, k2, k3, k4, k5 = jax.random.split(key, 5)

    # Deterministic parameter init (uniform, like nn.Linear default scale).
    bound_attn = 1.0 / jnp.sqrt(2.0 * H)
    bound_v = 1.0 / jnp.sqrt(float(H))
    w_attn = jax.random.uniform(k1, (H, 2 * H), jnp.float32, -bound_attn, bound_attn)
    b_attn = jax.random.uniform(k2, (H,), jnp.float32, -bound_attn, bound_attn)
    w_v = jax.random.uniform(k3, (1, H), jnp.float32, -bound_v, bound_v)

    hidden = jax.random.normal(k4, (B, H), jnp.float32)
    encoder_outputs = jax.random.normal(k5, (B, S, H), jnp.float32)

    out = attention_forward(hidden, encoder_outputs, w_attn, b_attn, w_v)
    out = jax.block_until_ready(out)

    ref = attention_reference(hidden, encoder_outputs, w_attn, b_attn, w_v)
    assert out.shape == (B, S)
    # Tolerance reflects the EUP approximate reciprocal used for the softmax
    # divide (~1e-4 relative error); everything else is f32-exact.
    assert jnp.allclose(out, ref, atol=2e-3, rtol=2e-3), "mismatch vs reference"
    assert jnp.allclose(jnp.sum(out, axis=1), 1.0, atol=2e-3), "rows must sum to 1"

    print("KERNEL_OK")
</pallas_src>

<mosaic_0001>
module attributes {stable_mosaic.version = 11 : i64} {
  func.func @attention_kernel(%arg0: i32, %arg1: memref<8x32xf32, #tpu.memory_space<vmem>>, %arg2: memref<8x8x32xf32, #tpu.memory_space<vmem>>, %arg3: memref<32x32xf32, #tpu.memory_space<vmem>>, %arg4: memref<32x32xf32, #tpu.memory_space<vmem>>, %arg5: memref<1x32xf32, #tpu.memory_space<vmem>>, %arg6: memref<1x32xf32, #tpu.memory_space<vmem>>, %arg7: memref<8x8xf32, #tpu.memory_space<vmem>>) attributes {dimension_semantics = [#tpu.dimension_semantics<parallel>], iteration_bounds = array<i64: 1>, scalar_prefetch = 0 : i64, scratch_operands = 0 : i64, tpu.core_type = #tpu.core_type<tc>, window_params = [{transform_indices = @transform_0, window_bounds = array<i64: 8, 32>}, {transform_indices = @transform_1, window_bounds = array<i64: 8, 8, 32>}, {pipeline_mode = #tpu.pipeline_mode<synchronous>, transform_indices = @transform_2, window_bounds = array<i64: 32, 32>}, {pipeline_mode = #tpu.pipeline_mode<synchronous>, transform_indices = @transform_3, window_bounds = array<i64: 32, 32>}, {pipeline_mode = #tpu.pipeline_mode<synchronous>, transform_indices = @transform_4, window_bounds = array<i64: 1, 32>}, {pipeline_mode = #tpu.pipeline_mode<synchronous>, transform_indices = @transform_5, window_bounds = array<i64: 1, 32>}, {transform_indices = @transform_6, window_bounds = array<i64: 8, 8>}]} {
    %c0 = arith.constant 0 : index
    %c0_0 = arith.constant 0 : index
    %0 = vector.load %arg1[%c0, %c0_0] : memref<8x32xf32, #tpu.memory_space<vmem>>, vector<8x32xf32>
    %c0_1 = arith.constant 0 : index
    %c0_2 = arith.constant 0 : index
    %1 = vector.load %arg3[%c0_1, %c0_2] : memref<32x32xf32, #tpu.memory_space<vmem>>, vector<32x32xf32>
    %cst = arith.constant dense<0.000000e+00> : vector<8x32xf32>
    %2 = tpu.matmul %0, %1, %cst {dimension_numbers = #tpu.dot_dimension_numbers<[1], [0], [0], [1], [0, 0, 1, 1], [], []>} : vector<8x32xf32>, vector<32x32xf32>, vector<8x32xf32> -> vector<8x32xf32>
    %c0_3 = arith.constant 0 : index
    %c0_4 = arith.constant 0 : index
    %3 = vector.load %arg5[%c0_3, %c0_4] : memref<1x32xf32, #tpu.memory_space<vmem>>, vector<1x32xf32>
    %4 = vector.broadcast %3 : vector<1x32xf32> to vector<8x32xf32>
    %5 = arith.addf %2, %4 : vector<8x32xf32>
    %c0_5 = arith.constant 0 : index
    %c0_6 = arith.constant 0 : index
    %c0_7 = arith.constant 0 : index
    %6 = vector.load %arg2[%c0_5, %c0_6, %c0_7] : memref<8x8x32xf32, #tpu.memory_space<vmem>>, vector<8x8x32xf32>
    %7 = vector.shape_cast %6 : vector<8x8x32xf32> to vector<64x32xf32>
    %c0_8 = arith.constant 0 : index
    %c0_9 = arith.constant 0 : index
    %8 = vector.load %arg4[%c0_8, %c0_9] : memref<32x32xf32, #tpu.memory_space<vmem>>, vector<32x32xf32>
    %cst_10 = arith.constant dense<0.000000e+00> : vector<64x32xf32>
    %9 = tpu.matmul %7, %8, %cst_10 {dimension_numbers = #tpu.dot_dimension_numbers<[1], [0], [0], [1], [0, 0, 1, 1], [], []>} : vector<64x32xf32>, vector<32x32xf32>, vector<64x32xf32> -> vector<64x32xf32>
    %10 = vector.shape_cast %9 : vector<64x32xf32> to vector<8x8x32xf32>
    %11 = vector.shape_cast %5 : vector<8x32xf32> to vector<8x1x32xf32>
    %12 = vector.broadcast %11 : vector<8x1x32xf32> to vector<8x8x32xf32>
    %13 = arith.addf %10, %12 : vector<8x8x32xf32>
    %14 = math.tanh %13 : vector<8x8x32xf32>
    %c0_11 = arith.constant 0 : index
    %c0_12 = arith.constant 0 : index
    %15 = vector.load %arg6[%c0_11, %c0_12] : memref<1x32xf32, #tpu.memory_space<vmem>>, vector<1x32xf32>
    %16 = vector.shape_cast %15 : vector<1x32xf32> to vector<1x1x32xf32>
    %17 = vector.broadcast %16 : vector<1x1x32xf32> to vector<8x8x32xf32>
    %18 = arith.mulf %14, %17 : vector<8x8x32xf32>
    %cst_13 = arith.constant dense<0.000000e+00> : vector<8x8xf32>
    %19 = vector.multi_reduction <add>, %18, %cst_13 [2] : vector<8x8x32xf32> to vector<8x8xf32>
    %cst_14 = arith.constant dense<0xFF800000> : vector<8xf32>
    %20 = vector.multi_reduction <maximumf>, %19, %cst_14 [1] : vector<8x8xf32> to vector<8xf32>
    %21 = vector.shape_cast %20 : vector<8xf32> to vector<8x1xf32>
    %22 = vector.broadcast %21 : vector<8x1xf32> to vector<8x8xf32>
    %23 = arith.subf %19, %22 : vector<8x8xf32>
    %24 = math.exp %23 : vector<8x8xf32>
    %cst_15 = arith.constant dense<0.000000e+00> : vector<8xf32>
    %25 = vector.multi_reduction <add>, %24, %cst_15 [1] : vector<8x8xf32> to vector<8xf32>
    %26 = vector.shape_cast %25 : vector<8xf32> to vector<8x1xf32>
    %27 = tpu.reciprocal %26 {approx = true} : vector<8x1xf32> -> vector<8x1xf32>
    %28 = vector.broadcast %27 : vector<8x1xf32> to vector<8x8xf32>
    %29 = arith.mulf %24, %28 : vector<8x8xf32>
    %c0_16 = arith.constant 0 : index
    %c0_17 = arith.constant 0 : index
    %30 = vector.load %arg7[%c0_16, %c0_17] : memref<8x8xf32, #tpu.memory_space<vmem>>, vector<8x8xf32>
    tpu.vector_store %arg7[%c0_16, %c0_17], %29 {strides = array<i32>} : memref<8x8xf32, #tpu.memory_space<vmem>>, vector<8x8xf32>,
    return
  }
  func.func @transform_0(%arg0: i32) -> (i32, i32) {
    %c0_i32 = arith.constant 0 : i32
    %c0_i32_0 = arith.constant 0 : i32
    return %arg0, %c0_i32 : i32, i32
  }
  func.func @transform_1(%arg0: i32) -> (i32, i32, i32) {
    %c0_i32 = arith.constant 0 : i32
    %c0_i32_0 = arith.constant 0 : i32
    %c0_i32_1 = arith.constant 0 : i32
    return %arg0, %c0_i32, %c0_i32_0 : i32, i32, i32
  }
  func.func @transform_2(%arg0: i32) -> (i32, i32) {
    %c0_i32 = arith.constant 0 : i32
    %c0_i32_0 = arith.constant 0 : i32
    %c0_i32_1 = arith.constant 0 : i32
    return %c0_i32, %c0_i32_0 : i32, i32
  }
  func.func @transform_3(%arg0: i32) -> (i32, i32) {
    %c0_i32 = arith.constant 0 : i32
    %c0_i32_0 = arith.constant 0 : i32
    %c0_i32_1 = arith.constant 0 : i32
    return %c0_i32, %c0_i32_0 : i32, i32
  }
  func.func @transform_4(%arg0: i32) -> (i32, i32) {
    %c0_i32 = arith.constant 0 : i32
    %c0_i32_0 = arith.constant 0 : i32
    %c0_i32_1 = arith.constant 0 : i32
    return %c0_i32, %c0_i32_0 : i32, i32
  }
  func.func @transform_5(%arg0: i32) -> (i32, i32) {
    %c0_i32 = arith.constant 0 : i32
    %c0_i32_0 = arith.constant 0 : i32
    %c0_i32_1 = arith.constant 0 : i32
    return %c0_i32, %c0_i32_0 : i32, i32
  }
  func.func @transform_6(%arg0: i32) -> (i32, i32) {
    %c0_i32 = arith.constant 0 : i32
    %c0_i32_0 = arith.constant 0 : i32
    return %arg0, %c0_i32 : i32, i32
  }
}

</mosaic_0001>

<bundles_post_ra>
// kernel: tpu_custom_call.1
= control target key start
LH: loop header
LB: loop body
LE: loop exit
PB: predicated region body
PF: predicated region fallthrough
CT: control target
= control target key end

     0   :  { %11 = vsyncpa [#allocation3], 0  ;;  %s821_s0 = inlined_call_operand.hbm [shape: f32[8,32], index: 0, kind: input, shape index: {}]   ;;  %s822_s1 = inlined_call_operand.hbm [shape: f32[8,8,32], index: 1, kind: input, shape index: {}]   ;;  %s823_s2 = inlined_call_operand.hbm [shape: f32[32,32], index: 2, kind: input, shape index: {}]   ;;  %s824_s3 = inlined_call_operand.hbm [shape: f32[32,32], index: 3, kind: input, shape index: {}]   ;;  %s825_s4 = inlined_call_operand.vmem [shape: f32[1,32], index: 4, kind: input, shape index: {}]   ;;  %s826_s5 = inlined_call_operand.vmem [shape: f32[1,32], index: 5, kind: input, shape index: {}]   ;;  %s827_s6 = inlined_call_operand.hbm [shape: f32[8,8], index: 6, kind: output, shape index: {}]  }
   0x1   :  { %12 = vsyncpa [#allocation6], 0 }
   0x2   :  { %13 = vsyncpa [#allocation9], 0  ;;  %s30_s23 = sshll.u32 %s822_s1, 4  ;;  %s31_s23 = int_to_ptr.hbm [resolvable:$true] %s30_s23 }
   0x3   :  { %14 = vsyncpa [#allocation4], 0  ;;  %s686_s24 = smov [#allocation5]   ;;  %s20_s28 = sshll.u32 %s821_s0, 4  ;;  %s21_s28 = int_to_ptr.hbm [resolvable:$true] %s20_s28 }
   0x4   :  { %s32_s25 = sshll.u32 %s686_s24, 4  ;;  %s687_s29 = smov 128   ;;  %s33_s25 = int_to_ptr.vmem [resolvable:$true] %s32_s25 }
   0x5   :  { %s688_s30 = smov 8   ;;  %s689_s7 = smov [#allocation2]  }
   0x6   :  { %38 = dma.hbm_to_vmem [thread:$0]  %s31_s23, 1024, %s33_s25, [#allocation6], %s687_s29, %s687_s29, %s688_s30  }
   0x7   :  { %s22_s8 = sshll.u32 %s689_s7, 4  ;;  %s43_s11 = sshll.u32 %s823_s2, 4  ;;  %s23_s8 = int_to_ptr.vmem [resolvable:$true] %s22_s8  ;;  %s44_s11 = int_to_ptr.hbm [resolvable:$true] %s43_s11 }
   0x8   :  { %25 = dma.hbm_to_vmem [thread:$0]  %s21_s28, 128, %s23_s8, [#allocation3]  }
   0x9   :  { %s56_s13 = sshll.u32 %s824_s3, 4  ;;  %s690_s14 = smov [#allocation7]   ;;  %s57_s13 = int_to_ptr.hbm [resolvable:$true] %s56_s13 }
   0xa   :  { %s45_s15 = sshll.u32 %s690_s14, 4  ;;  %s691_s0 = smov [#allocation8]   ;;  %s46_s15 = int_to_ptr.vmem [resolvable:$true] %s45_s15 }
   0xb   :  { %51 = dma.hbm_to_vmem [thread:$0]  %s44_s11, 512, %s46_s15, [#allocation6], %s687_s29, %s687_s29, %s688_s30  }
   0xc   :  { %s58_s16 = sshll.u32 %s691_s0, 4  ;;  %s59_s16 = int_to_ptr.vmem [resolvable:$true] %s58_s16 }
   0xd   :  { %64 = dma.hbm_to_vmem [thread:$0]  %s57_s13, 512, %s59_s16, [#allocation9], %s687_s29, %s687_s29, %s688_s30  }
   0xe   :  { %678 = dma.done.wait [#allocation3], 128  }
   0xf   :  { %679 = vsyncadd [#allocation3], 4294967168 }
  0x10   :  { %680 = dma.done.wait [#allocation6], 1536  }
  0x11   :  { %681 = vsyncadd [#allocation6], 4294965760 }
  0x12   :  { %682 = dma.done.wait [#allocation9], 512  }
  0x13   :  { %683 = vsyncadd [#allocation9], 4294966784  ;;  %v89_v0 = vld [vmem:[#allocation7 + $0x18] sm:$0xff]  ;;  %v88_v2 = vld [vmem:[#allocation7 + $0x10] sm:$0xff]  ;;  %vm94_vm0 = vcmask 261120   ;;  %vm289_vm1 = vcmask 1041409  }
  0x14   :  { %v129_v1 = vld [vmem:[#allocation8 + $0x18] sm:$0xff]  ;;  %110 = vmatpush.msra.mxu0 %v89_v0  ;;  %v128_v3 = vld [vmem:[#allocation8 + $0x10] sm:$0xff]  ;;  %v87_v4 = vld [vmem:[#allocation7 + $0x8] sm:$0xff]  ;;  %vm291_vm2 = vcmask 1042434   ;;  %vm293_vm3 = vcmask 1043459   ;;  %vm295_vm4 = vcmask 1044484  }
  0x15   :  { %503 = vmatpush.msra.mxu2 %v129_v1  ;;  %504 = vmatpush.msra.mxu3 %v129_v1  ;;  %v127_v5 = vld [vmem:[#allocation8 + $0x8] sm:$0xff]  ;;  %v86_v6 = vld [vmem:[#allocation7] sm:$0xff]  ;;  %v85_v8 = vld [vmem:[#allocation2] sm:$0xff]  ;;  %vm297_vm5 = vcmask 1045509   ;;  %vm299_vm6 = vcmask 1046534   ;;  %vm301_vm7 = vcmask 1047559  }
  0x16   :  { %166 = vmatpush.msra.mxu1 %v129_v1  ;;  %111 = vmatpush.msra.mxu0 %v88_v2  ;;  %v126_v7 = vld [vmem:[#allocation8] sm:$0xff]  ;;  %v120_v9 = vld [vmem:[#allocation5 + $0x10] sm:$0xff]  ;;  %v123_v10 = vld [vmem:[#allocation5 + $0x28] sm:$0xff]  ;;  %vm304_vm8 = vcmask 64512   ;;  %s482_s21 = sshll.u32 %s827_s6, 4  ;;  %s483_s21 = int_to_ptr.hbm [resolvable:$true] %s482_s21 }
  0x17   :  { %505 = vmatpush.msra.mxu2 %v128_v3  ;;  %506 = vmatpush.msra.mxu3 %v128_v3  ;;  %v118_v11 = vld [vmem:[#allocation5] sm:$0xff]  ;;  %v121_v12 = vld [vmem:[#allocation5 + $0x18] sm:$0xff]  ;;  %v124_v13 = vld [vmem:[#allocation5 + $0x30] sm:$0xff] }
  0x18   :  { %167 = vmatpush.msra.mxu1 %v128_v3  ;;  %112 = vmatpush.msra.mxu0 %v87_v4  ;;  %v119_v14 = vld [vmem:[#allocation5 + $0x8] sm:$0xff]  ;;  %v122_v15 = vld [vmem:[#allocation5 + $0x20] sm:$0xff]  ;;  %v125_v16 = vld [vmem:[#allocation5 + $0x38] sm:$0xff] }
  0x19   :  { %507 = vmatpush.msra.mxu2 %v127_v5  ;;  %508 = vmatpush.msra.mxu3 %v127_v5  ;;  %v522_v17 = vld [vmem:[%s825_s4] ss:$0 sm:$0xff]  ;;  %s693_s4 = smov [#allocation10]  }
  0x1a   :  { %168 = vmatpush.msra.mxu1 %v127_v5  ;;  %113 = vmatpush.msra.mxu0 %v86_v6  ;;  %v523_v32 = vld [vmem:[%s826_s5] ss:$0 sm:$0xff]  ;;  %s480_s5 = sshll.u32 %s693_s4, 4  ;;  %s481_s5 = int_to_ptr.vmem [resolvable:$true] %s480_s5 }
  0x1b   :  { %509 = vmatpush.msra.mxu2 %v126_v7  ;;  %510 = vmatpush.msra.mxu3 %v126_v7 }
  0x1c   :  { %494 = vmatmul.msk.f32.vlgmr.msra.gmra.mxu0 %vm94_vm0, %v85_v8  ;;  %497 = vmatmul.msk.f32.vlgmr.msra.gmra.mxu2 %vm94_vm0, %v120_v9 }
  0x1d   :  { %500 = vmatmul.msk.f32.vlgmr.msra.gmra.mxu3 %vm94_vm0, %v123_v10  ;;  %169 = vmatpush.msra.mxu1 %v126_v7 }
  0x1e   :  { %495 = vmatmul.msk.f32.vlgmr.msra.gmra.mxu1 %vm94_vm0, %v118_v11 }
  0x24   :  { %498 = vmatmul.msk.f32.gmra.mxu2 %vm94_vm0, %v121_v12 }
  0x25   :  { %501 = vmatmul.msk.f32.gmra.mxu3 %vm94_vm0, %v124_v13 }
  0x26   :  { %496 = vmatmul.msk.f32.gmra.mxu1 %vm94_vm0, %v119_v14  ;;  %v279_v14 = vlaneseq }
  0x2c   :  { %499 = vmatmul.msk.f32.gmra.mxu2 %vm94_vm0, %v122_v15 }
  0x2d   :  { %502 = vmatmul.msk.f32.gmra.mxu3 %vm94_vm0, %v125_v16  ;;  %v764_v16 = vand.u32 127, %v279_v14 }
  0x99   :  { %v115_v18 = vpop.f32.mrf.mxu0 }
  0x9a   :  { %v116_v19 = vadd.f32 %v522_v17, %v115_v18 }
  0x9b   :  { %v171_v20 = vpop.f32.mrf.mxu1 }
  0x9c   :  { %v203_v21 = vperm.slane %v116_v19, 0  ;;  %v197_v22 = vrot.slane %v116_v19, 2  ;;  %v196_v23 = vrot.slane %v116_v19, 1  ;;  %v198_v30 = vrot.slane %v116_v19, 3 }
  0x9d   :  { %v201_v31 = vrot.slane %v116_v19, 6  ;;  %v200_v46 = vrot.slane %v116_v19, 5  ;;  %v199_v47 = vrot.slane %v116_v19, 4  ;;  %v202_v48 = vrot.slane %v116_v19, 7 }
  0x9e   :  { %v219_v24 = vadd.f32 %v203_v21, %v171_v20  ;;  %v205_v25 = vperm.slane %v197_v22, 0  ;;  %v204_v29 = vperm.slane %v196_v23, 0  ;;  %v206_v35 = vperm.slane %v198_v30, 0 }
  0x9f   :  { %v177_v26 = vpop.f32.mrf.mxu2  ;;  %v209_v36 = vperm.slane %v201_v31, 0  ;;  %v208_v52 = vperm.slane %v200_v46, 0  ;;  %v207_v53 = vperm.slane %v199_v47, 0  ;;  %v210_v54 = vperm.slane %v202_v48, 0 }
  0xa0   :  { %524 = vtanh.f32 %v219_v24  ;;  %v186_v27 = vpop.f32.mrf.mxu3  ;;  %v221_v28 = vadd.f32 %v205_v25, %v177_v26 }
  0xa1   :  { %v224_v63 = vadd.f32 %v208_v52, %v186_v27 }
  0xa2   :  { %526 = vtanh.f32 %v221_v28 }
  0xa3   :  { %v174_v33 = vpop.f32.mrf.mxu1 }
  0xa4   :  { %v220_v34 = vadd.f32 %v204_v29, %v174_v33 }
  0xa6   :  { %v525_v37 = vpop.eup %524  ;;  %528 = vtanh.f32 %v220_v34 }
  0xa7   :  { %v239_v38 = vmul.f32 %v525_v37, %v523_v32  ;;  %v180_v39 = vpop.f32.mrf.mxu2 }
  0xa8   :  { %v189_v40 = vpop.f32.mrf.mxu3  ;;  %v527_v41 = vpop.eup %526  ;;  %v222_v42 = vadd.f32 %v206_v35, %v180_v39 }
  0xa9   :  { %v225_v43 = vadd.f32 %v209_v36, %v189_v40  ;;  %v247_v44 = vsel %vm94_vm0, %v239_v38, 0.0  ;;  %v241_v45 = vmul.f32 %v527_v41, %v523_v32  ;;  %v692_v38 = vmov 0  }
  0xaa   :  { %248 = vadd.xlane.f32.xlu0 %v247_v44  ;;  %530 = vtanh.f32 %v222_v42  ;;  %521 = vset.pattern.permute.xlu2 %v692_v38 }
  0xab   :  { %532 = vtanh.f32 %v225_v43  ;;  %v253_v49 = vsel %vm94_vm0, %v241_v45, 0.0  ;;  %520 = vset.pattern.permute.xlu1 %v692_v38  ;;  %519 = vset.pattern.permute.xlu0 %v692_v38 }
  0xac   :  { %v529_v50 = vpop.eup %528  ;;  %254 = vadd.xlane.f32.xlu1 %v253_v49 }
  0xad   :  { %v240_v51 = vmul.f32 %v529_v50, %v523_v32 }
  0xaf   :  { %v183_v55 = vpop.f32.mrf.mxu2  ;;  %v250_v57 = vsel %vm94_vm0, %v240_v51, 0.0 }
  0xb0   :  { %v192_v56 = vpop.f32.mrf.mxu3  ;;  %v531_v58 = vpop.eup %530  ;;  %v223_v59 = vadd.f32 %v207_v53, %v183_v55 }
  0xb1   :  { %v226_v60 = vadd.f32 %v210_v54, %v192_v56  ;;  %v533_v61 = vpop.eup %532  ;;  %v242_v62 = vmul.f32 %v531_v58, %v523_v32 }
  0xb2   :  { %251 = vadd.xlane.f32.xlu0 %v250_v57  ;;  %534 = vtanh.f32 %v223_v59  ;;  %v245_v1 = vmul.f32 %v533_v61, %v523_v32 }
  0xb3   :  { %536 = vtanh.f32 %v226_v60  ;;  %v256_v0 = vsel %vm94_vm0, %v242_v62, 0.0 }
  0xb4   :  { %257 = vadd.xlane.f32.xlu1 %v256_v0  ;;  %538 = vtanh.f32 %v224_v63  ;;  %v265_v3 = vsel %vm94_vm0, %v245_v1, 0.0 }
  0xb8   :  { %v535_v2 = vpop.eup %534 }
  0xb9   :  { %v537_v4 = vpop.eup %536  ;;  %v243_v5 = vmul.f32 %v535_v2, %v523_v32 }
  0xba   :  { %266 = vadd.xlane.f32.xlu0 %v265_v3  ;;  %v246_v6 = vmul.f32 %v537_v4, %v523_v32  ;;  %v539_v8 = vpop.eup %538 }
  0xbb   :  { %v259_v7 = vsel %vm94_vm0, %v243_v5, 0.0  ;;  %v244_v10 = vmul.f32 %v539_v8, %v523_v32 }
  0xbc   :  { %260 = vadd.xlane.f32.xlu2 %v259_v7  ;;  %v268_v9 = vsel %vm94_vm0, %v246_v6, 0.0 }
  0xbd   :  { %269 = vadd.xlane.f32.xlu1 %v268_v9  ;;  %v262_v11 = vsel %vm94_vm0, %v244_v10, 0.0 }
  0xc4   :  { %263 = vadd.xlane.f32.xlu2 %v262_v11 }
 0x11d   :  { %v249_v12 = vpop.xlane.xlu0 %248 }
 0x11e   :  { %v281_v18 = vperm.slane %v249_v12, %v764_v16 }
 0x11f   :  { %v255_v13 = vpop.xlane.xlu1 %254 }
 0x120   :  { %v283_v22 = vperm.slane %v255_v13, %v764_v16 }
 0x125   :  { %v252_v15 = vpop.xlane.xlu0 %251 }
 0x126   :  { %v282_v19 = vperm.slane %v252_v15, %v764_v16 }
 0x127   :  { %v258_v17 = vpop.xlane.xlu1 %257 }
 0x128   :  { %v290_v21 = vsel %vm289_vm1, %v282_v19, %v281_v18  ;;  %v284_v23 = vperm.slane %v258_v17, %v764_v16 }
 0x129   :  { %v292_v24 = vsel %vm291_vm2, %v283_v22, %v290_v21 }
 0x12a   :  { %v294_v29 = vsel %vm293_vm3, %v284_v23, %v292_v24 }
 0x12d   :  { %v267_v26 = vpop.xlane.xlu0 %266 }
 0x12e   :  { %v287_v31 = vperm.slane %v267_v26, %v764_v16 }
 0x12f   :  { %v261_v20 = vpop.xlane.xlu2 %260 }
 0x130   :  { %v285_v25 = vperm.slane %v261_v20, %v764_v16  ;;  %v270_v27 = vpop.xlane.xlu1 %269 }
 0x131   :  { %v288_v33 = vperm.slane %v270_v27, %v764_v16 }
 0x132   :  { %v296_v32 = vsel %vm295_vm4, %v285_v25, %v294_v29 }
 0x137   :  { %v264_v28 = vpop.xlane.xlu2 %263 }
 0x138   :  { %v286_v30 = vperm.slane %v264_v28, %v764_v16 }
 0x13a   :  { %v298_v34 = vsel %vm297_vm5, %v286_v30, %v296_v32 }
 0x13b   :  { %v300_v35 = vsel %vm299_vm6, %v287_v31, %v298_v34 }
 0x13c   :  { %v302_v36 = vsel %vm301_vm7, %v288_v33, %v300_v35 }
 0x13d   :  { %v305_v37 = vsel %vm304_vm8, %v302_v36, -inf }
 0x13e   :  { %306 = vmax.xlane.f32.xlu2 %v305_v37 }
 0x1b1   :  { %v307_v39 = vpop.xlane.xlu2 %306 }
 0x1b2   :  { %v311_v40 = vperm.slane %v307_v39, 2  ;;  %v310_v41 = vperm.slane %v307_v39, 1  ;;  %v309_v42 = vperm.slane %v307_v39, 0  ;;  %v312_v46 = vperm.slane %v307_v39, 3 }
 0x1b3   :  { %v313_v47 = vperm.slane %v307_v39, 4  ;;  %v316_v48 = vperm.slane %v307_v39, 7  ;;  %v314_v56 = vperm.slane %v307_v39, 5  ;;  %v315_v58 = vperm.slane %v307_v39, 6 }
 0x1b4   :  { %v327_v43 = vsub.f32 %v255_v13, %v311_v40  ;;  %v326_v44 = vsub.f32 %v252_v15, %v310_v41  ;;  %v325_v45 = vsub.f32 %v249_v12, %v309_v42  ;;  %v328_v52 = vsub.f32 %v258_v17, %v312_v46 }
 0x1b5   :  { %v329_v53 = vsub.f32 %v261_v20, %v313_v47  ;;  %v332_v54 = vsub.f32 %v270_v27, %v316_v48  ;;  %v330_v63 = vsub.f32 %v264_v28, %v314_v56  ;;  %v331_v0 = vsub.f32 %v267_v26, %v315_v58 }
 0x1b6   :  { %v337_v49 = vmul.f32 1.442695, %v327_v43  ;;  %v335_v50 = vmul.f32 1.442695, %v326_v44  ;;  %v333_v51 = vmul.f32 1.442695, %v325_v45 }
 0x1b7   :  { %v339_v55 = vmul.f32 1.442695, %v328_v52  ;;  %v341_v57 = vmul.f32 1.442695, %v329_v53  ;;  %v347_v60 = vmul.f32 1.442695, %v332_v54 }
 0x1b8   :  { %540 = vpow2.f32 %v337_v49  ;;  %v343_v1 = vmul.f32 1.442695, %v330_v63  ;;  %v345_v2 = vmul.f32 1.442695, %v331_v0 }
 0x1b9   :  { %542 = vpow2.f32 %v335_v50 }
 0x1ba   :  { %544 = vpow2.f32 %v333_v51 }
 0x1bb   :  { %546 = vpow2.f32 %v339_v55 }
 0x1bc   :  { %548 = vpow2.f32 %v341_v57 }
 0x1bd   :  { %550 = vpow2.f32 %v347_v60 }
 0x1be   :  { %v782_v59 = vpop.eup %540  ;;  %552 = vpow2.f32 %v343_v1 }
 0x1bf   :  { %v543_v61 = vpop.eup %542  ;;  %364 = vperm.xlu2 %521, %v782_v59   ;;  %554 = vpow2.f32 %v345_v2 }
 0x1c0   :  { %v545_v62 = vpop.eup %544  ;;  %361 = vperm.xlu1 %520, %v543_v61  }
 0x1c1   :  { %358 = vperm.xlu0 %519, %v545_v62   ;;  %v547_v3 = vpop.eup %546 }
 0x1c2   :  { %v549_v4 = vpop.eup %548 }
 0x1c3   :  { %v551_v5 = vpop.eup %550 }
 0x1c4   :  { %v553_v6 = vpop.eup %552 }
 0x1c5   :  { %v555_v7 = vpop.eup %554 }
 0x1c7   :  { %367 = vperm.xlu2 %521, %v547_v3  }
 0x1c8   :  { %370 = vperm.xlu1 %520, %v549_v4  }
 0x1c9   :  { %379 = vperm.xlu0 %519, %v551_v5  }
 0x1cf   :  { %373 = vperm.xlu2 %521, %v553_v6  }
 0x1d0   :  { %376 = vperm.xlu1 %520, %v555_v7  }
 0x219   :  { %v365_v8 = vpop.permute.xlu2 %364 }
 0x21a   :  { %v383_v17 = vperm.slane %v365_v8, %v764_v16 }
 0x221   :  { %v368_v11 = vpop.permute.xlu2 %367 }
 0x222   :  { %v384_v20 = vperm.slane %v368_v11, %v764_v16 }
 0x229   :  { %v374_v21 = vpop.permute.xlu2 %373 }
 0x22a   :  { %v386_v25 = vperm.slane %v374_v21, %v764_v16 }
 0x232   :  { %v362_v9 = vpop.permute.xlu1 %361 }
 0x233   :  { %v359_v10 = vpop.permute.xlu0 %358  ;;  %v382_v12 = vperm.slane %v362_v9, %v764_v16 }
 0x234   :  { %v381_v13 = vperm.slane %v359_v10, %v764_v16 }
 0x236   :  { %v389_v14 = vsel %vm289_vm1, %v382_v12, %v381_v13 }
 0x237   :  { %v390_v18 = vsel %vm291_vm2, %v383_v17, %v389_v14 }
 0x238   :  { %v391_v22 = vsel %vm293_vm3, %v384_v20, %v390_v18 }
 0x23a   :  { %v371_v15 = vpop.permute.xlu1 %370 }
 0x23b   :  { %v385_v19 = vperm.slane %v371_v15, %v764_v16  ;;  %v380_v24 = vpop.permute.xlu0 %379 }
 0x23c   :  { %v388_v28 = vperm.slane %v380_v24, %v764_v16 }
 0x23d   :  { %v392_v23 = vsel %vm295_vm4, %v385_v19, %v391_v22 }
 0x23e   :  { %v393_v29 = vsel %vm297_vm5, %v386_v25, %v392_v23 }
 0x242   :  { %v377_v26 = vpop.permute.xlu1 %376 }
 0x243   :  { %v387_v27 = vperm.slane %v377_v26, %v764_v16 }
 0x245   :  { %v394_v30 = vsel %vm299_vm6, %v387_v27, %v393_v29 }
 0x246   :  { %v395_v31 = vsel %vm301_vm7, %v388_v28, %v394_v30 }
 0x247   :  { %v397_v32 = vsel %vm304_vm8, %v395_v31, 0.0 }
 0x248   :  { %398 = vadd.xlane.f32.xlu2 %v397_v32 }
 0x2bb   :  { %v399_v33 = vpop.xlane.xlu2 %398 }
 0x2bc   :  { %556 = vrcp.f32 %v399_v33 }
 0x2c2   :  { %v557_v34 = vpop.eup %556 }
 0x2c3   :  { %v403_v35 = vperm.slane %v557_v34, 1  ;;  %v402_v36 = vperm.slane %v557_v34, 0  ;;  %v405_v39 = vperm.slane %v557_v34, 3  ;;  %v404_v40 = vperm.slane %v557_v34, 2 }
 0x2c4   :  { %v407_v43 = vperm.slane %v557_v34, 5  ;;  %v406_v44 = vperm.slane %v557_v34, 4  ;;  %v409_v47 = vperm.slane %v557_v34, 7  ;;  %v408_v48 = vperm.slane %v557_v34, 6 }
 0x2c5   :  { %v419_v37 = vmul.f32 %v543_v61, %v403_v35  ;;  %v418_v38 = vmul.f32 %v545_v62, %v402_v36  ;;  %v421_v41 = vmul.f32 %v547_v3, %v405_v39  ;;  %v420_v42 = vmul.f32 %v782_v59, %v404_v40 }
 0x2c6   :  { %v423_v45 = vmul.f32 %v553_v6, %v407_v43  ;;  %v422_v46 = vmul.f32 %v549_v4, %v406_v44  ;;  %v425_v49 = vmul.f32 %v551_v5, %v409_v47  ;;  %v424_v50 = vmul.f32 %v555_v7, %v408_v48 }
 0x2c7   :  { %438 = vperm.xlu0 %519, %v419_v37   ;;  %435 = vperm.xlu1 %520, %v418_v38  }
 0x2cf   :  { %444 = vperm.xlu0 %519, %v421_v41   ;;  %441 = vperm.xlu1 %520, %v420_v42  }
 0x2d7   :  { %450 = vperm.xlu0 %519, %v423_v45   ;;  %447 = vperm.xlu1 %520, %v422_v46  }
 0x2df   :  { %456 = vperm.xlu0 %519, %v425_v49   ;;  %453 = vperm.xlu1 %520, %v424_v50  }
 0x339   :  { %v439_v51 = vpop.permute.xlu0 %438  ;;  %v436_v52 = vpop.permute.xlu1 %435 }
 0x33a   :  { %v459_v55 = vperm.slane %v439_v51, %v764_v16  ;;  %v458_v56 = vperm.slane %v436_v52, %v764_v16 }
 0x33c   :  { %v466_v60 = vsel %vm289_vm1, %v459_v55, %v458_v56 }
 0x341   :  { %v445_v53 = vpop.permute.xlu0 %444  ;;  %v442_v54 = vpop.permute.xlu1 %441 }
 0x342   :  { %v460_v57 = vperm.slane %v442_v54, %v764_v16  ;;  %v461_v61 = vperm.slane %v445_v53, %v764_v16 }
 0x344   :  { %v467_v62 = vsel %vm291_vm2, %v460_v57, %v466_v60 }
 0x345   :  { %v468_v1 = vsel %vm293_vm3, %v461_v61, %v467_v62 }
 0x349   :  { %v451_v58 = vpop.permute.xlu0 %450  ;;  %v448_v59 = vpop.permute.xlu1 %447 }
 0x34a   :  { %v462_v63 = vperm.slane %v448_v59, %v764_v16  ;;  %v463_v0 = vperm.slane %v451_v58, %v764_v16 }
 0x34c   :  { %v469_v2 = vsel %vm295_vm4, %v462_v63, %v468_v1 }
 0x34d   :  { %v470_v7 = vsel %vm297_vm5, %v463_v0, %v469_v2 }
 0x351   :  { %v457_v3 = vpop.permute.xlu0 %456  ;;  %v454_v4 = vpop.permute.xlu1 %453 }
 0x352   :  { %v465_v5 = vperm.slane %v457_v3, %v764_v16  ;;  %v464_v6 = vperm.slane %v454_v4, %v764_v16 }
 0x354   :  { %v471_v8 = vsel %vm299_vm6, %v464_v6, %v470_v7 }
 0x355   :  { %v472_v9 = vsel %vm301_vm7, %v465_v5, %v471_v8 }
 0x356   :  { %474 = vst.msk [vmem:[#allocation10] sm:$0xff] %vm304_vm8, %v472_v9 }
 0x357   :  { %485 = dma.vmem_to_hbm [thread:$0]  %s481_s5, 128, %s483_s21, [#allocation4]  }
 0x358   :  { %684 = dma.done.wait [#allocation4], 128  }
 0x359   :  { %685 = vsyncadd [#allocation4], 4294967168 }
 0x35a   :  { %490 = vsyncpa [#allocation3], 1 }
 0x35b   :  { %491 = vsyncpa [#allocation6], 1 }
 0x35c   :  { %492 = vsyncpa [#allocation9], 1 }
 0x35d   :  { %493 = vsyncpa [#allocation4], 1 }

</bundles_post_ra>
